<compile_context>
chip_gen: v7x
topology: tpu7x:2x2x1
jax: 0.10.0
libtpu: 0.0.40
codegen_flags: <defaults>
</compile_context>

<pallas_src>
import functools

import jax
import jax.numpy as jnp
from jax.experimental import pallas as pl
from jax.experimental.pallas import tpu as pltpu

_LANES = 128
_SUBLANES = 8
_MIB = 1024 * 1024


def _round_up(x: int, m: int) -> int:
    return ((x + m - 1) // m) * m


def _vmem_capacity_bytes() -> int:
    """Physical VMEM per TensorCore (generation-aware tiling budget)."""
    try:
        cap = int(getattr(pltpu.get_tpu_info(), "vmem_capacity_bytes", 0) or 0)
        if cap > 0:
            return cap
    except Exception:
        pass
    return 64 * _MIB  # conservative fallback = v7x per-TC VMEM


# -----------------------------------------------------------------------------
# Kernels
# -----------------------------------------------------------------------------
def _softmax_kernel_single(x_ref, w_ref, b_ref, o_ref, *, dot_dtype):
    """Linear + softmax over the class axis; whole class axis resident in VMEM."""
    x = x_ref[...]
    cast_to = w_ref.dtype if dot_dtype is None else dot_dtype
    if x.dtype != cast_to:
        x = x.astype(cast_to)                         # in-VMEM cast, free VPU slot
    logits = jnp.dot(x, w_ref[...], preferred_element_type=jnp.float32)
    logits = logits + b_ref[...]                      # (1, Cp) f32 bias broadcast
    m = jnp.max(logits, axis=-1, keepdims=True)
    e = jnp.exp(logits - m)                           # padded cols: exp(-1e30 - m) == 0
    inv = pl.reciprocal(jnp.sum(e, axis=-1, keepdims=True), approx=True)  # EUP slot
    o_ref[...] = (e * inv).astype(o_ref.dtype)


def _softmax_kernel_ntiled(x_ref, w_ref, b_ref, o_ref, m_sc, s_sc, *, dot_dtype):
    """Two-phase online softmax with the class axis tiled.

    phase 0 (p==0): accumulate running row-max / row-sum over class tiles.
    phase 1 (p==1): recompute logits and write normalized probabilities per tile.
    """
    p = pl.program_id(1)   # phase
    j = pl.program_id(2)   # class tile

    @pl.when(jnp.logical_and(p == 0, j == 0))
    def _init():
        m_sc[...] = jnp.full_like(m_sc, -jnp.inf)
        s_sc[...] = jnp.zeros_like(s_sc)

    x = x_ref[...]
    cast_to = w_ref.dtype if dot_dtype is None else dot_dtype
    if x.dtype != cast_to:
        x = x.astype(cast_to)
    logits = jnp.dot(x, w_ref[...], preferred_element_type=jnp.float32)
    logits = logits + b_ref[...]

    @pl.when(p == 0)
    def _stats():
        m_prev = m_sc[...]
        m_new = jnp.maximum(m_prev, jnp.max(logits, axis=-1, keepdims=True))
        s_sc[...] = (s_sc[...] * jnp.exp(m_prev - m_new)
                     + jnp.sum(jnp.exp(logits - m_new), axis=-1, keepdims=True))
        m_sc[...] = m_new

    @pl.when(p == 1)
    def _write():
        inv = pl.reciprocal(s_sc[...], approx=True)
        o_ref[...] = (jnp.exp(logits - m_sc[...]) * inv).astype(o_ref.dtype)


# -----------------------------------------------------------------------------
# Tiling / wrapper
# -----------------------------------------------------------------------------
def _pick_batch_tile(B, C_in, cout_block, x_itemsize, w_itemsize,
                     out_itemsize, block_b, vmem_budget):
    TB = max(_SUBLANES, _round_up(min(block_b, B), _SUBLANES))
    if B >= 64:
        # Guarantee >= 2 grid steps so ("parallel", ...) can shard the batch axis
        # across both v7x TensorCores (and keep the DMA pipeline busy everywhere).
        TB = min(TB, _round_up((B + 1) // 2, _SUBLANES))

    def est(tb):
        return int(2 * tb * C_in * x_itemsize             # x tiles, double buffered
                   + tb * C_in * 2                        # in-kernel low-precision copy
                   + 2 * C_in * cout_block * w_itemsize   # weight block(s)
                   + 2 * cout_block * 4                   # bias block(s)
                   + 2 * tb * cout_block * out_itemsize   # out tiles, double buffered
                   + 3 * tb * cout_block * 4)             # f32 logits / exp temporaries

    while TB > _SUBLANES and est(TB) > vmem_budget:
        TB = max(_SUBLANES, _round_up(TB // 2, _SUBLANES))
    return TB, est(TB)


def make_softmax_classifier(w, b, *, dot_dtype=jnp.bfloat16, out_dtype=None,
                            block_b=512, block_n=None, cout_single_max=4096):
    """Build a fused Linear + softmax(dim=1) apply function.

    w : (C_in, C_out)  (== torch Linear weight.T), b : (C_out,)
    dot_dtype : MXU input dtype (None -> exact path in w.dtype); x is cast in-kernel.
    out_dtype : stored probability dtype (None -> x.dtype; bf16 halves writeback bytes).
    Parameter padding / casting happens exactly once here (not per call).
    """
    C_in, C_out = w.shape
    assert b.shape == (C_out,)
    dot_dt = None if dot_dtype is None else jnp.dtype(dot_dtype)
    out_dt = None if out_dtype is None else jnp.dtype(out_dtype)

    # ---- choose class-axis layout / kernel path (once) -----------------------
    if (block_n is not None and C_out > block_n) or C_out > cout_single_max:
        tn = block_n if block_n is not None else 512
        TN = max(_LANES, _round_up(tn, _LANES))
        C_out_p = _round_up(C_out, TN)
        tiled = True
    else:
        tiled, TN = False, None
        # Small C_out: store (B, C_out) directly (masked vst beats 8x padded bytes
        # + an extra slice pass). Larger non-128-multiple C_out: pad lane-dense.
        C_out_p = C_out if (C_out <= _LANES or C_out % _LANES == 0) \
            else _round_up(C_out, _LANES)

    # ---- pad + cast parameters once (hoisted out of the per-call path) -------
    w_dt = dot_dt if dot_dt is not None else jnp.dtype(w.dtype)
    if C_out_p != C_out:
        w_p = jnp.zeros((C_in, C_out_p), w_dt).at[:, :C_out].set(w.astype(w_dt))
        # Padded class columns must vanish under softmax: bias -> -1e30 so exp == 0.
        b_p = jnp.full((1, C_out_p), -1e30, jnp.float32)
        b_p = b_p.at[0, :C_out].set(b.astype(jnp.float32))
    else:
        w_p = w.astype(w_dt)
        b_p = b.astype(jnp.float32).reshape(1, C_out)

    vmem_cap = _vmem_capacity_bytes()
    vmem_budget = int(0.7 * vmem_cap)

    @jax.jit
    def apply(x):
        B, c_in_x = x.shape
        assert c_in_x == C_in
        odt = out_dt if out_dt is not None else jnp.dtype(x.dtype)
        cout_block = TN if tiled else C_out_p
        TB, est = _pick_batch_tile(
            B, C_in, cout_block,
            x_itemsize=jnp.dtype(x.dtype).itemsize,
            w_itemsize=jnp.dtype(w_dt).itemsize,
            out_itemsize=jnp.dtype(odt).itemsize,
            block_b=block_b, vmem_budget=vmem_budget)
        vmem_limit = int(min(max(2 * est, 16 * _MIB), int(0.8 * vmem_cap)))
        n_b = pl.cdiv(B, TB)

        if not tiled:
            cost = pl.CostEstimate(
                flops=2 * B * C_in * C_out_p,
                transcendentals=B * C_out_p,
                bytes_accessed=int(B * C_in * jnp.dtype(x.dtype).itemsize
                                   + C_in * C_out_p * jnp.dtype(w_dt).itemsize
                                   + C_out_p * 4
                                   + B * C_out_p * jnp.dtype(odt).itemsize))
            out = pl.pallas_call(
                functools.partial(_softmax_kernel_single, dot_dtype=dot_dt),
                out_shape=jax.ShapeDtypeStruct((B, C_out_p), odt),
                grid=(n_b,),
                in_specs=[
                    pl.BlockSpec((TB, C_in), lambda i: (i, 0)),        # x tile / step
                    pl.BlockSpec((C_in, C_out_p), lambda i: (0, 0)),   # W resident
                    pl.BlockSpec((1, C_out_p), lambda i: (0, 0)),      # bias resident
                ],
                out_specs=pl.BlockSpec((TB, C_out_p), lambda i: (i, 0)),
                compiler_params=pltpu.CompilerParams(
                    dimension_semantics=("parallel",),
                    vmem_limit_bytes=vmem_limit),
                cost_estimate=cost,
            )(x, w_p, b_p)
        else:
            n_n = C_out_p // TN
            cost = pl.CostEstimate(
                flops=4 * B * C_in * C_out_p,        # logits computed in both phases
                transcendentals=2 * B * C_out_p,
                bytes_accessed=int(B * C_in * jnp.dtype(x.dtype).itemsize
                                   + 2 * C_in * C_out_p * jnp.dtype(w_dt).itemsize
                                   + 2 * C_out_p * 4
                                   + B * C_out_p * jnp.dtype(odt).itemsize))
            out = pl.pallas_call(
                functools.partial(_softmax_kernel_ntiled, dot_dtype=dot_dt),
                out_shape=jax.ShapeDtypeStruct((B, C_out_p), odt),
                grid=(n_b, 2, n_n),
                in_specs=[
                    pl.BlockSpec((TB, C_in), lambda i, p, j: (i, 0)),  # x resident over p,j
                    pl.BlockSpec((C_in, TN), lambda i, p, j: (0, j)),  # W class tile
                    pl.BlockSpec((1, TN), lambda i, p, j: (0, j)),     # bias class tile
                ],
                # Phase 0 parks the (unwritten) out buffer on class tile 0, so each
                # output block is only written back after phase 1 fills it.
                out_specs=pl.BlockSpec((TB, TN), lambda i, p, j: (i, j * p)),
                scratch_shapes=[pltpu.VMEM((TB, 1), jnp.float32),   # running max
                                pltpu.VMEM((TB, 1), jnp.float32)],  # running sum
                compiler_params=pltpu.CompilerParams(
                    dimension_semantics=("parallel", "arbitrary", "arbitrary"),
                    vmem_limit_bytes=vmem_limit),
                cost_estimate=cost,
            )(x, w_p, b_p)

        if C_out_p != C_out:
            out = out[:, :C_out]
        return out

    return apply


# -----------------------------------------------------------------------------
# Demo / self-test
# -----------------------------------------------------------------------------
if __name__ == "__main__":
    key = jax.random.PRNGKey(0)
    kx, kw, kb, kx2, kw2, kb2 = jax.random.split(key, 6)
    HI = jax.lax.Precision.HIGHEST

    # --- Case 1: small shapes typical for this module (single-block path,
    #     direct unpadded (B, C_out) output -> no padded writeback, no slice).
    B, C_in, C_out = 8, 32, 16
    x = jax.random.normal(kx, (B, C_in), dtype=jnp.float32)
    w = jax.random.normal(kw, (C_in, C_out), dtype=jnp.float32) / jnp.sqrt(C_in)
    b = jax.random.normal(kb, (C_out,), dtype=jnp.float32) * 0.01
    ref = jax.nn.softmax(jnp.dot(x, w, precision=HI) + b, axis=1)

    # Exact f32 MXU path.
    clf_f32 = make_softmax_classifier(w, b, dot_dtype=None)
    out_f32 = jax.block_until_ready(clf_f32(x))
    assert out_f32.shape == (B, C_out) and out_f32.dtype == jnp.float32
    assert jnp.allclose(out_f32, ref, atol=5e-3, rtol=1e-2), \
        float(jnp.max(jnp.abs(out_f32 - ref)))
    assert jnp.allclose(jnp.sum(out_f32, axis=1), 1.0, atol=1e-2)

    # bf16 MXU inputs (x cast in-kernel), f32 softmax math, f32 probs.
    clf_bf16 = make_softmax_classifier(w, b, dot_dtype=jnp.bfloat16)
    out_bf16 = jax.block_until_ready(clf_bf16(x))
    assert jnp.allclose(out_bf16, ref, atol=2e-2, rtol=5e-2), \
        float(jnp.max(jnp.abs(out_bf16 - ref)))

    # bf16 stored probabilities (halves the dominant output writeback bytes).
    clf_bf16o = make_softmax_classifier(w, b, dot_dtype=jnp.bfloat16,
                                        out_dtype=jnp.bfloat16)
    out_bf16o = jax.block_until_ready(clf_bf16o(x))
    assert out_bf16o.dtype == jnp.bfloat16
    assert jnp.allclose(out_bf16o.astype(jnp.float32), ref, atol=3e-2, rtol=1e-1)

    # --- Case 2: exercise the C_out-tiled online-softmax path (forced block_n),
    #     ragged batch tile (36 % 16 != 0) and padded class axis (300 -> 384).
    B2, C_in2, C_out2 = 36, 64, 300
    x2 = jax.random.normal(kx2, (B2, C_in2), dtype=jnp.float32)
    w2 = jax.random.normal(kw2, (C_in2, C_out2), dtype=jnp.float32) / jnp.sqrt(C_in2)
    b2 = jax.random.normal(kb2, (C_out2,), dtype=jnp.float32) * 0.01
    ref2 = jax.nn.softmax(jnp.dot(x2, w2, precision=HI) + b2, axis=1)

    clf2 = make_softmax_classifier(w2, b2, dot_dtype=None, block_n=128, block_b=16)
    out2 = jax.block_until_ready(clf2(x2))
    assert out2.shape == (B2, C_out2)
    assert jnp.allclose(out2, ref2, atol=5e-3, rtol=1e-2), \
        float(jnp.max(jnp.abs(out2 - ref2)))
    assert jnp.allclose(jnp.sum(out2, axis=1), 1.0, atol=1e-2)

    print("KERNEL_OK")
</pallas_src>

<mosaic_0001>
module attributes {stable_mosaic.version = 11 : i64} {
  func.func @_softmax_kernel_single(%arg0: i32, %arg1: memref<8x32xf32, #tpu.memory_space<vmem>>, %arg2: memref<32x16xf32, #tpu.memory_space<vmem>>, %arg3: memref<1x16xf32, #tpu.memory_space<vmem>>, %arg4: memref<8x16xf32, #tpu.memory_space<vmem>>) attributes {dimension_semantics = [#tpu.dimension_semantics<parallel>], iteration_bounds = array<i64: 1>, scalar_prefetch = 0 : i64, scratch_operands = 0 : i64, tpu.core_type = #tpu.core_type<tc>, window_params = [{transform_indices = @transform_0, window_bounds = array<i64: 8, 32>}, {pipeline_mode = #tpu.pipeline_mode<synchronous>, transform_indices = @transform_1, window_bounds = array<i64: 32, 16>}, {pipeline_mode = #tpu.pipeline_mode<synchronous>, transform_indices = @transform_2, window_bounds = array<i64: 1, 16>}, {transform_indices = @transform_3, window_bounds = array<i64: 8, 16>}]} {
    %c0 = arith.constant 0 : index
    %c0_0 = arith.constant 0 : index
    %0 = vector.load %arg1[%c0, %c0_0] : memref<8x32xf32, #tpu.memory_space<vmem>>, vector<8x32xf32>
    %c0_1 = arith.constant 0 : index
    %c0_2 = arith.constant 0 : index
    %1 = vector.load %arg2[%c0_1, %c0_2] : memref<32x16xf32, #tpu.memory_space<vmem>>, vector<32x16xf32>
    %cst = arith.constant dense<0.000000e+00> : vector<8x16xf32>
    %2 = tpu.matmul %0, %1, %cst {dimension_numbers = #tpu.dot_dimension_numbers<[1], [0], [0], [1], [0, 0, 1, 1], [], []>} : vector<8x32xf32>, vector<32x16xf32>, vector<8x16xf32> -> vector<8x16xf32>
    %c0_3 = arith.constant 0 : index
    %c0_4 = arith.constant 0 : index
    %3 = vector.load %arg3[%c0_3, %c0_4] : memref<1x16xf32, #tpu.memory_space<vmem>>, vector<1x16xf32>
    %4 = vector.broadcast %3 : vector<1x16xf32> to vector<8x16xf32>
    %5 = arith.addf %2, %4 : vector<8x16xf32>
    %cst_5 = arith.constant dense<0xFF800000> : vector<8xf32>
    %6 = vector.multi_reduction <maximumf>, %5, %cst_5 [1] : vector<8x16xf32> to vector<8xf32>
    %7 = vector.shape_cast %6 : vector<8xf32> to vector<8x1xf32>
    %8 = vector.broadcast %7 : vector<8x1xf32> to vector<8x16xf32>
    %9 = arith.subf %5, %8 : vector<8x16xf32>
    %10 = math.exp %9 : vector<8x16xf32>
    %cst_6 = arith.constant dense<0.000000e+00> : vector<8xf32>
    %11 = vector.multi_reduction <add>, %10, %cst_6 [1] : vector<8x16xf32> to vector<8xf32>
    %12 = vector.shape_cast %11 : vector<8xf32> to vector<8x1xf32>
    %13 = tpu.reciprocal %12 {approx = true} : vector<8x1xf32> -> vector<8x1xf32>
    %14 = vector.broadcast %13 : vector<8x1xf32> to vector<8x16xf32>
    %15 = arith.mulf %10, %14 : vector<8x16xf32>
    %c0_7 = arith.constant 0 : index
    %c0_8 = arith.constant 0 : index
    %16 = vector.load %arg4[%c0_7, %c0_8] : memref<8x16xf32, #tpu.memory_space<vmem>>, vector<8x16xf32>
    tpu.vector_store %arg4[%c0_7, %c0_8], %15 {strides = array<i32>} : memref<8x16xf32, #tpu.memory_space<vmem>>, vector<8x16xf32>,
    return
  }
  func.func @transform_0(%arg0: i32) -> (i32, i32) {
    %c0_i32 = arith.constant 0 : i32
    %c0_i32_0 = arith.constant 0 : i32
    return %arg0, %c0_i32 : i32, i32
  }
  func.func @transform_1(%arg0: i32) -> (i32, i32) {
    %c0_i32 = arith.constant 0 : i32
    %c0_i32_0 = arith.constant 0 : i32
    %c0_i32_1 = arith.constant 0 : i32
    return %c0_i32, %c0_i32_0 : i32, i32
  }
  func.func @transform_2(%arg0: i32) -> (i32, i32) {
    %c0_i32 = arith.constant 0 : i32
    %c0_i32_0 = arith.constant 0 : i32
    %c0_i32_1 = arith.constant 0 : i32
    return %c0_i32, %c0_i32_0 : i32, i32
  }
  func.func @transform_3(%arg0: i32) -> (i32, i32) {
    %c0_i32 = arith.constant 0 : i32
    %c0_i32_0 = arith.constant 0 : i32
    return %arg0, %c0_i32 : i32, i32
  }
}

</mosaic_0001>

<bundles_post_ra>
// kernel: apply.1
= control target key start
LH: loop header
LB: loop body
LE: loop exit
PB: predicated region body
PF: predicated region fallthrough
CT: control target
= control target key end

     0   :  { %8 = vsyncpa [#allocation3], 0  ;;  %s341_s0 = inlined_call_operand.hbm [shape: f32[8,32], index: 0, kind: input, shape index: {}]   ;;  %s342_s1 = inlined_call_operand.hbm [shape: f32[32,16], index: 1, kind: input, shape index: {}]   ;;  %s343_s2 = inlined_call_operand.vmem [shape: f32[1,16], index: 2, kind: input, shape index: {}]   ;;  %s344_s3 = inlined_call_operand.hbm [shape: f32[8,16], index: 3, kind: output, shape index: {}]  }
   0x1   :  { %9 = vsyncpa [#allocation6], 0 }
   0x2   :  { %10 = vsyncpa [#allocation4], 0  ;;  %s264_s12 = smov [#allocation2]   ;;  %s265_s14 = smov [#allocation5]  }
   0x3   :  { %s17_s13 = sshll.u32 %s264_s12, 4  ;;  %s26_s15 = sshll.u32 %s265_s14, 4  ;;  %s18_s13 = int_to_ptr.vmem [resolvable:$true] %s17_s13  ;;  %s292_s15 = int_to_ptr.vmem [resolvable:$true] %s26_s15 }
   0x4   :  { %s192_s18 = scalar_lea.hbm %s341_s0, 128 }
   0x5   :  { %p193_p0 = scmp.ne.s32.totalorder %s341_s0, %s192_s18  ;;  %p196_p1 = scmp.lt.u32.totalorder %s192_s18, %s341_s0 }
   0x7   :  { %p198_p2 = pnand %p196_p1, %p193_p0 }
   0x9   :  { %201 = shalt.err (!%p198_p2)
}
   0xa   :  { %s202_s23 = scalar_lea.vmem %s18_s13, 128  ;;  %p207_p4 = scmp.lt.s32.totalorder %s18_s13, %s18_s13 }
   0xb   :  { %p203_p3 = scmp.ne.s32.totalorder %s18_s13, %s202_s23  ;;  %p208_p5 = scmp.lt.s32.totalorder %s202_s23, %s202_s23 }
   0xd   :  { %p209_p6 = por %p208_p5, %p207_p4 }
   0xf   :  { %p210_p7 = pnand %p209_p6, %p203_p3 }
  0x11   :  { %213 = shalt.err (!%p210_p7)
}
  0x12   :  { %20 = dma.hbm_to_vmem [thread:$0]  %s341_s0, 128, %s18_s13, [#allocation3]  }
  0x13   :  { %s214_s28 = scalar_lea.hbm %s342_s1, 512 }
  0x14   :  { %p215_p8 = scmp.ne.s32.totalorder %s342_s1, %s214_s28  ;;  %p218_p9 = scmp.lt.u32.totalorder %s214_s28, %s342_s1 }
  0x16   :  { %p220_p10 = pnand %p218_p9, %p215_p8 }
  0x18   :  { %223 = shalt.err (!%p220_p10)
}
  0x19   :  { %s224_s6 = scalar_lea.vmem %s292_s15, 512  ;;  %p229_p12 = scmp.lt.s32.totalorder %s292_s15, %s292_s15 }
  0x1a   :  { %p225_p11 = scmp.ne.s32.totalorder %s292_s15, %s224_s6  ;;  %p230_p13 = scmp.lt.s32.totalorder %s224_s6, %s224_s6 }
  0x1c   :  { %p231_p0 = por %p230_p13, %p229_p12 }
  0x1e   :  { %p232_p1 = pnand %p231_p0, %p225_p11 }
  0x20   :  { %235 = shalt.err (!%p232_p1)
}
  0x21   :  { %s266_s0 = smov 128   ;;  %s267_s7 = smov 8  }
  0x22   :  { %32 = dma.hbm_to_vmem [thread:$0]  %s342_s1, 512, %s292_s15, [#allocation6], %s266_s0, %s266_s0, %s267_s7  }
  0x23   :  { %258 = dma.done.wait [#allocation3], 128  }
  0x24   :  { %259 = vsyncadd [#allocation3], 4294967168 }
  0x25   :  { %260 = dma.done.wait [#allocation6], 512  }
  0x26   :  { %261 = vsyncadd [#allocation6], 4294966784  ;;  %v268_v0 = vmov 0.0|0.0   ;;  %vm269_vm0 = vmmov 0   ;;  %v270_v1 = vmov 0.0   ;;  %v42_v2 = vld [vmem:[#allocation5] sm:$0xff] }
  0x27   :  { %174 = vmatprep.subr.bf16.mxu0 %v268_v0  ;;  %171 = vmatprep.mubr.msk.f32.mxu0 %vm269_vm0, %v270_v1  ;;  %v43_v3 = vld [vmem:[#allocation5 + $0x8] sm:$0xff]  ;;  %v44_v4 = vld [vmem:[#allocation5 + $0x10] sm:$0xff]  ;;  %v45_v6 = vld [vmem:[#allocation5 + $0x18] sm:$0xff]  ;;  %vm53_vm1 = vcmask 261120   ;;  %vm127_vm2 = vcmask 130048   ;;  %s271_s11 = smov [#allocation7]  }
  0x28   :  { %v175_v5 = vpack.c.bf16 %v43_v3, %v42_v2  ;;  %v178_v7 = vpack.c.bf16 %v45_v6, %v44_v4  ;;  %v41_v8 = vld [vmem:[#allocation2] sm:$0xff]  ;;  %s146_s12 = sshll.u32 %s271_s11, 4  ;;  %s147_s12 = int_to_ptr.vmem [resolvable:$true] %s146_s12 }
  0x29   :  { %v156_v9 = vld [vmem:[%s343_s2] ss:$0 sm:$0xff]  ;;  %s236_s2 = scalar_lea.vmem %s147_s12, 128  ;;  %p241_p3 = scmp.lt.s32.totalorder %s147_s12, %s147_s12 }
  0x2a   :  { %176 = vmatpush3.bf16.msra.mxu0 %v175_v5  ;;  %p237_p2 = scmp.ne.s32.totalorder %s147_s12, %s236_s2  ;;  %p242_p4 = scmp.lt.s32.totalorder %s236_s2, %s236_s2 }
  0x2b   :  { %177 = vmatprep.subr.bf16.mxu0 %v268_v0 }
  0x2c   :  { %p243_p5 = por %p242_p4, %p241_p3 }
  0x2e   :  { %179 = vmatpush3.bf16.msra.mxu0 %v178_v7  ;;  %p244_p6 = pnand %p243_p5, %p237_p2 }
  0x31   :  { %172 = vmatmul.mubr.msk.f32.vlgmr.msra.gmra.mrb[0].mxu0 %vm53_vm1, %v41_v8 }
 0x104   :  { %v123_v10 = vpop.f32.mrb[0].mxu0 }
 0x105   :  { %v124_v11 = vadd.f32 %v156_v9, %v123_v10  ;;  %v173_v12 = vpop.f32.mrb[1].mxu0 }
 0x107   :  { %v128_v13 = vsel %vm127_vm2, %v124_v11, -inf }
 0x108   :  { %129 = vmax.xlane.f32.xlu0 %v128_v13 }
 0x195   :  { %v130_v14 = vpop.xlane.xlu0 %129 }
 0x196   :  { %v131_v15 = vsub.f32 %v124_v11, %v130_v14 }
 0x198   :  { %v132_v16 = vmul.f32 1.442695, %v131_v15 }
 0x19a   :  { %188 = vpow2.f32 %v132_v16 }
 0x1a4   :  { %v189_v17 = vpop.eup %188 }
 0x1a5   :  { %v134_v18 = vsel %vm127_vm2, %v189_v17, 0.0 }
 0x1a6   :  { %135 = vadd.xlane.f32.xlu0 %v134_v18 }
 0x233   :  { %v136_v19 = vpop.xlane.xlu0 %135 }
 0x234   :  { %190 = vrcp.f32 %v136_v19 }
 0x23e   :  { %v191_v20 = vpop.eup %190 }
 0x23f   :  { %v138_v21 = vmul.f32 %v191_v20, %v189_v17 }
 0x241   :  { %139 = vst.msk [vmem:[#allocation7] sm:$0xff] %vm127_vm2, %v138_v21 }
 0x242   :  { %247 = shalt.err (!%p244_p6)
}
 0x243   :  { %s248_s15 = scalar_lea.hbm %s344_s3, 128 }
 0x244   :  { %p249_p7 = scmp.ne.s32.totalorder %s344_s3, %s248_s15  ;;  %p252_p8 = scmp.lt.u32.totalorder %s248_s15, %s344_s3 }
 0x246   :  { %p254_p9 = pnand %p252_p8, %p249_p7 }
 0x248   :  { %257 = shalt.err (!%p254_p9)
}
 0x249   :  { %149 = dma.vmem_to_hbm [thread:$0]  %s147_s12, 128, %s344_s3, [#allocation4]  }
 0x24a   :  { %262 = dma.done.wait [#allocation4], 128  }
 0x24b   :  { %263 = vsyncadd [#allocation4], 4294967168 }
 0x24c   :  { %153 = vsyncpa [#allocation3], 1 }
 0x24d   :  { %154 = vsyncpa [#allocation6], 1 }
 0x24e   :  { %155 = vsyncpa [#allocation4], 1 }

</bundles_post_ra>
